<compile_context>
chip_gen: v5e
topology: v5e:2x2
jax: 0.10.0
libtpu: 0.0.40
codegen_flags: <defaults>
</compile_context>

<pallas_src>
import numpy as np
import jax
import jax.numpy as jnp
from jax.experimental import pallas as pl
from jax.experimental.pallas import tpu as pltpu

CHANNEL_NUM = 512
SUBSET = CHANNEL_NUM // 5  # 102
SIZE_LISTS = [
    [SUBSET, CHANNEL_NUM - SUBSET],          # [102, 410]
    [SUBSET * 2, CHANNEL_NUM - SUBSET * 2],  # [204, 308]
    [SUBSET * 3, CHANNEL_NUM - SUBSET * 3],  # [306, 206]
    [SUBSET * 4, CHANNEL_NUM - SUBSET * 4],  # [408, 104]
]
HID = 64


def _round_up(x, m):
    return ((x + m - 1) // m) * m


def _torch_linear_init(key, in_f, out_f):
    """Deterministic init mimicking PyTorch nn.Linear default U(-1/sqrt(in), 1/sqrt(in))."""
    k1, k2 = jax.random.split(key)
    bound = 1.0 / np.sqrt(in_f)
    w = jax.random.uniform(k1, (out_f, in_f), minval=-bound, maxval=bound, dtype=jnp.float32)
    b = jax.random.uniform(k2, (out_f,), minval=-bound, maxval=bound, dtype=jnp.float32)
    return np.asarray(w), np.asarray(b)


def init_params(key, num_classes):
    """Builds fused / padded kernel parameters plus the raw per-layer weights (for reference)."""
    keys = jax.random.split(key, 4 * 3 + 1)

    # --- raw PyTorch-equivalent weights ---------------------------------------------------
    W_first = np.zeros((CHANNEL_NUM, 4 * 2 * HID), dtype=np.float32)   # (512, 512) padded slices
    b_first = np.zeros((4 * 2 * HID,), dtype=np.float32)
    W_layer = np.zeros((4 * 2 * HID, 4 * HID), dtype=np.float32)       # (512, 256) block-diagonal
    b_layer = np.zeros((4 * HID,), dtype=np.float32)
    kidx = 0
    raw = {"lin": [], "layer": []}
    for p in range(4):
        sizes = SIZE_LISTS[p]
        lins = []
        row_start = 0
        for j in range(2):
            in_f = sizes[j]
            w, b = _torch_linear_init(keys[kidx], in_f, HID); kidx += 1
            lins.append((w, b))
            col = p * 2 * HID + j * HID
            W_first[row_start:row_start + in_f, col:col + HID] = w.T
            b_first[col:col + HID] = b
            row_start += in_f
        wl, bl = _torch_linear_init(keys[kidx], 2 * HID, HID); kidx += 1
        W_layer[p * 2 * HID:(p + 1) * 2 * HID, p * HID:(p + 1) * HID] = wl.T
        b_layer[p * HID:(p + 1) * HID] = bl
        raw["lin"].append(lins)
        raw["layer"].append((wl, bl))
    w_last, b_last = _torch_linear_init(keys[kidx], 258, num_classes)
    raw["last"] = (w_last, b_last)

    # --- exact offline fusion of the purely-linear chain: linList -> layerLin --------------
    W_fused = W_first @ W_layer                       # (512, 256)
    b_fused = b_first @ W_layer + b_layer             # (256,)

    # --- lane-dense padding of the final projection ----------------------------------------
    C = num_classes
    CP = max(128, _round_up(C, 128))
    W_last_p = np.zeros((4 * HID, CP), dtype=np.float32)
    W_last_p[:, :C] = w_last[:, 2:].T                 # packet part (256, C)
    b_last_p = np.zeros((1, CP), dtype=np.float32)
    b_last_p[0, :C] = b_last
    w_am = np.zeros((2, CP), dtype=np.float32)        # row 0: age weights, row 1: MMSE weights
    w_am[0, :C] = w_last[:, 0]
    w_am[1, :C] = w_last[:, 1]

    params = dict(
        W_fused=jnp.asarray(W_fused, dtype=jnp.bfloat16),    # (512, 256) bf16
        b_fused=jnp.asarray(b_fused, dtype=jnp.float32)[None, :],  # (1, 256) f32
        W_last=jnp.asarray(W_last_p, dtype=jnp.bfloat16),     # (256, CP) bf16
        b_last=jnp.asarray(b_last_p, dtype=jnp.float32),      # (1, CP)  f32
        w_am=jnp.asarray(w_am, dtype=jnp.float32),            # (2, CP)  f32
        num_classes=num_classes,
        c_padded=CP,
    )
    return params, raw


def _packet_layer_kernel(x_ref, am_ref, wf_ref, bf_ref, wlast_ref, blast_ref, wam_ref, o_ref):
    # Fused linList + layerLin (exact linear fold): (TB,512)bf16 @ (512,256)bf16 -> f32
    x = x_ref[...].astype(jnp.bfloat16)
    z = jnp.dot(x, wf_ref[...], preferred_element_type=jnp.float32) + bf_ref[...]
    # LeakyReLU, PyTorch default negative_slope = 0.01 (f32, VPU)
    y = jnp.where(z >= 0.0, z, 0.01 * z)
    # Final projection over the 4 packet outputs, padded to 128 lanes
    out = jnp.dot(y.astype(jnp.bfloat16), wlast_ref[...], preferred_element_type=jnp.float32)
    # age / MMSE rank-1 contributions + bias, all f32
    am = am_ref[...]          # (TB, 2)
    wam = wam_ref[...]        # (2, CP)
    out = out + am[:, 0:1] * wam[0:1, :] + am[:, 1:2] * wam[1:2, :] + blast_ref[...]
    o_ref[...] = out


def packet_layer_forward(x, age, mmse, params):
    B = x.shape[0]
    C = params["num_classes"]
    CP = params["c_padded"]

    # Batch tiling: TB rows per grid step (>= 8 for sublane alignment, <= 256 for VMEM budget)
    TB = min(256, _round_up(B, 8))
    Bp = _round_up(B, TB)

    am = jnp.stack([age.astype(jnp.float32), mmse.astype(jnp.float32)], axis=1)  # (B, 2)
    if Bp != B:
        x = jnp.pad(x, ((0, Bp - B), (0, 0)))
        am = jnp.pad(am, ((0, Bp - B), (0, 0)))

    grid = (Bp // TB,)
    out = pl.pallas_call(
        _packet_layer_kernel,
        out_shape=jax.ShapeDtypeStruct((Bp, CP), jnp.float32),
        grid_spec=pltpu.PrefetchScalarGridSpec(
            num_scalar_prefetch=0,
            grid=grid,
            in_specs=[
                pl.BlockSpec((TB, CHANNEL_NUM), lambda i: (i, 0)),   # x        (batch-tiled)
                pl.BlockSpec((TB, 2), lambda i: (i, 0)),             # [age, MMSE]
                pl.BlockSpec((CHANNEL_NUM, 4 * HID), lambda i: (0, 0)),  # W_fused  (resident)
                pl.BlockSpec((1, 4 * HID), lambda i: (0, 0)),            # b_fused  (resident)
                pl.BlockSpec((4 * HID, CP), lambda i: (0, 0)),           # W_last   (resident)
                pl.BlockSpec((1, CP), lambda i: (0, 0)),                 # b_last   (resident)
                pl.BlockSpec((2, CP), lambda i: (0, 0)),                 # w_age/w_mmse
            ],
            out_specs=pl.BlockSpec((TB, CP), lambda i: (i, 0)),
        ),
        compiler_params=pltpu.CompilerParams(
            dimension_semantics=("parallel",)),
    )(x, am, params["W_fused"], params["b_fused"],
      params["W_last"], params["b_last"], params["w_am"])
    return out[:B, :C]


def reference_forward(x, age, mmse, raw):
    """Pure-JAX reference replicating the original per-slice PyTorch structure (f32)."""
    outs = []
    for p in range(4):
        sizes = SIZE_LISTS[p]
        off = 0
        hs = []
        for j in range(2):
            w, b = raw["lin"][p][j]
            hs.append(x[:, off:off + sizes[j]] @ jnp.asarray(w).T + jnp.asarray(b))
            off += sizes[j]
        h = jnp.concatenate(hs, axis=1)
        wl, bl = raw["layer"][p]
        z = h @ jnp.asarray(wl).T + jnp.asarray(bl)
        outs.append(jnp.where(z >= 0, z, 0.01 * z))
    w_last, b_last = raw["last"]
    feat = jnp.concatenate(
        [age[:, None].astype(jnp.float32), mmse[:, None].astype(jnp.float32)] + outs, axis=1)
    return feat @ jnp.asarray(w_last).T + jnp.asarray(b_last)


if __name__ == "__main__":
    num_classes = 8
    B = 8
    key = jax.random.PRNGKey(0)
    kp, kx, ka, km = jax.random.split(key, 4)
    params, raw = init_params(kp, num_classes)

    x = jax.random.normal(kx, (B, CHANNEL_NUM), dtype=jnp.float32)
    age = jax.random.uniform(ka, (B,), minval=50.0, maxval=90.0, dtype=jnp.float32)
    mmse = jax.random.uniform(km, (B,), minval=0.0, maxval=30.0, dtype=jnp.float32)

    out = packet_layer_forward(x, age, mmse, params)
    out = jax.block_until_ready(out)
    assert out.shape == (B, num_classes)

    ref = jax.block_until_ready(reference_forward(x, age, mmse, raw))
    # bf16 matmul inputs with f32 accumulation -> ~0.5% relative error budget
    np.testing.assert_allclose(np.asarray(out), np.asarray(ref), rtol=2e-2, atol=2e-2)

    print("KERNEL_OK")
</pallas_src>

<mosaic_0001>
module attributes {stable_mosaic.version = 11 : i64} {
  func.func @_packet_layer_kernel(%arg0: i32, %arg1: memref<8x512xf32, #tpu.memory_space<vmem>>, %arg2: memref<8x2xf32, #tpu.memory_space<vmem>>, %arg3: memref<512x256xbf16, #tpu.memory_space<vmem>>, %arg4: memref<1x256xf32, #tpu.memory_space<vmem>>, %arg5: memref<256x128xbf16, #tpu.memory_space<vmem>>, %arg6: memref<1x128xf32, #tpu.memory_space<vmem>>, %arg7: memref<2x128xf32, #tpu.memory_space<vmem>>, %arg8: memref<8x128xf32, #tpu.memory_space<vmem>>) attributes {dimension_semantics = [#tpu.dimension_semantics<parallel>], iteration_bounds = array<i64: 1>, scalar_prefetch = 0 : i64, scratch_operands = 0 : i64, tpu.core_type = #tpu.core_type<tc>, window_params = [{transform_indices = @transform_0, window_bounds = array<i64: 8, 512>}, {transform_indices = @transform_1, window_bounds = array<i64: 8, 2>}, {pipeline_mode = #tpu.pipeline_mode<synchronous>, transform_indices = @transform_2, window_bounds = array<i64: 512, 256>}, {pipeline_mode = #tpu.pipeline_mode<synchronous>, transform_indices = @transform_3, window_bounds = array<i64: 1, 256>}, {pipeline_mode = #tpu.pipeline_mode<synchronous>, transform_indices = @transform_4, window_bounds = array<i64: 256, 128>}, {pipeline_mode = #tpu.pipeline_mode<synchronous>, transform_indices = @transform_5, window_bounds = array<i64: 1, 128>}, {pipeline_mode = #tpu.pipeline_mode<synchronous>, transform_indices = @transform_6, window_bounds = array<i64: 2, 128>}, {transform_indices = @transform_7, window_bounds = array<i64: 8, 128>}]} {
    %c0 = arith.constant 0 : index
    %c0_0 = arith.constant 0 : index
    %0 = vector.load %arg1[%c0, %c0_0] : memref<8x512xf32, #tpu.memory_space<vmem>>, vector<8x512xf32>
    %1 = arith.truncf %0 : vector<8x512xf32> to vector<8x512xbf16>
    %c0_1 = arith.constant 0 : index
    %c0_2 = arith.constant 0 : index
    %2 = vector.load %arg3[%c0_1, %c0_2] : memref<512x256xbf16, #tpu.memory_space<vmem>>, vector<512x256xbf16>
    %cst = arith.constant dense<0.000000e+00> : vector<8x256xf32>
    %3 = tpu.matmul %1, %2, %cst {dimension_numbers = #tpu.dot_dimension_numbers<[1], [0], [0], [1], [0, 0, 1, 1], [], []>} : vector<8x512xbf16>, vector<512x256xbf16>, vector<8x256xf32> -> vector<8x256xf32>
    %c0_3 = arith.constant 0 : index
    %c0_4 = arith.constant 0 : index
    %4 = vector.load %arg4[%c0_3, %c0_4] : memref<1x256xf32, #tpu.memory_space<vmem>>, vector<1x256xf32>
    %5 = vector.broadcast %4 : vector<1x256xf32> to vector<8x256xf32>
    %6 = arith.addf %3, %5 : vector<8x256xf32>
    %cst_5 = arith.constant 0.000000e+00 : f32
    %7 = vector.broadcast %cst_5 : f32 to vector<8x256xf32>
    %8 = arith.cmpf oge, %6, %7 : vector<8x256xf32>
    %cst_6 = arith.constant 0.00999999977 : f32
    %9 = vector.broadcast %cst_6 : f32 to vector<8x256xf32>
    %10 = arith.mulf %9, %6 : vector<8x256xf32>
    %11 = arith.select %8, %6, %10 : vector<8x256xi1>, vector<8x256xf32>
    %12 = arith.truncf %11 : vector<8x256xf32> to vector<8x256xbf16>
    %c0_7 = arith.constant 0 : index
    %c0_8 = arith.constant 0 : index
    %13 = vector.load %arg5[%c0_7, %c0_8] : memref<256x128xbf16, #tpu.memory_space<vmem>>, vector<256x128xbf16>
    %cst_9 = arith.constant dense<0.000000e+00> : vector<8x128xf32>
    %14 = tpu.matmul %12, %13, %cst_9 {dimension_numbers = #tpu.dot_dimension_numbers<[1], [0], [0], [1], [0, 0, 1, 1], [], []>} : vector<8x256xbf16>, vector<256x128xbf16>, vector<8x128xf32> -> vector<8x128xf32>
    %c0_10 = arith.constant 0 : index
    %c0_11 = arith.constant 0 : index
    %15 = vector.load %arg2[%c0_10, %c0_11] : memref<8x2xf32, #tpu.memory_space<vmem>>, vector<8x2xf32>
    %c0_12 = arith.constant 0 : index
    %c0_13 = arith.constant 0 : index
    %16 = vector.load %arg7[%c0_12, %c0_13] : memref<2x128xf32, #tpu.memory_space<vmem>>, vector<2x128xf32>
    %17 = vector.extract_strided_slice %15 {offsets = [0, 0], sizes = [8, 1], strides = [1, 1]} : vector<8x2xf32> to vector<8x1xf32>
    %18 = vector.extract_strided_slice %16 {offsets = [0, 0], sizes = [1, 128], strides = [1, 1]} : vector<2x128xf32> to vector<1x128xf32>
    %19 = vector.broadcast %17 : vector<8x1xf32> to vector<8x128xf32>
    %20 = vector.broadcast %18 : vector<1x128xf32> to vector<8x128xf32>
    %21 = arith.mulf %19, %20 : vector<8x128xf32>
    %22 = arith.addf %14, %21 : vector<8x128xf32>
    %23 = vector.extract_strided_slice %15 {offsets = [0, 1], sizes = [8, 1], strides = [1, 1]} : vector<8x2xf32> to vector<8x1xf32>
    %24 = vector.extract_strided_slice %16 {offsets = [1, 0], sizes = [1, 128], strides = [1, 1]} : vector<2x128xf32> to vector<1x128xf32>
    %25 = vector.broadcast %23 : vector<8x1xf32> to vector<8x128xf32>
    %26 = vector.broadcast %24 : vector<1x128xf32> to vector<8x128xf32>
    %27 = arith.mulf %25, %26 : vector<8x128xf32>
    %28 = arith.addf %22, %27 : vector<8x128xf32>
    %c0_14 = arith.constant 0 : index
    %c0_15 = arith.constant 0 : index
    %29 = vector.load %arg6[%c0_14, %c0_15] : memref<1x128xf32, #tpu.memory_space<vmem>>, vector<1x128xf32>
    %30 = vector.broadcast %29 : vector<1x128xf32> to vector<8x128xf32>
    %31 = arith.addf %28, %30 : vector<8x128xf32>
    %c0_16 = arith.constant 0 : index
    %c0_17 = arith.constant 0 : index
    %32 = vector.load %arg8[%c0_16, %c0_17] : memref<8x128xf32, #tpu.memory_space<vmem>>, vector<8x128xf32>
    tpu.vector_store %arg8[%c0_16, %c0_17], %31 {strides = array<i32>} : memref<8x128xf32, #tpu.memory_space<vmem>>, vector<8x128xf32>,
    return
  }
  func.func @transform_0(%arg0: i32) -> (i32, i32) {
    %c0_i32 = arith.constant 0 : i32
    %c0_i32_0 = arith.constant 0 : i32
    return %arg0, %c0_i32 : i32, i32
  }
  func.func @transform_1(%arg0: i32) -> (i32, i32) {
    %c0_i32 = arith.constant 0 : i32
    %c0_i32_0 = arith.constant 0 : i32
    return %arg0, %c0_i32 : i32, i32
  }
  func.func @transform_2(%arg0: i32) -> (i32, i32) {
    %c0_i32 = arith.constant 0 : i32
    %c0_i32_0 = arith.constant 0 : i32
    %c0_i32_1 = arith.constant 0 : i32
    return %c0_i32, %c0_i32_0 : i32, i32
  }
  func.func @transform_3(%arg0: i32) -> (i32, i32) {
    %c0_i32 = arith.constant 0 : i32
    %c0_i32_0 = arith.constant 0 : i32
    %c0_i32_1 = arith.constant 0 : i32
    return %c0_i32, %c0_i32_0 : i32, i32
  }
  func.func @transform_4(%arg0: i32) -> (i32, i32) {
    %c0_i32 = arith.constant 0 : i32
    %c0_i32_0 = arith.constant 0 : i32
    %c0_i32_1 = arith.constant 0 : i32
    return %c0_i32, %c0_i32_0 : i32, i32
  }
  func.func @transform_5(%arg0: i32) -> (i32, i32) {
    %c0_i32 = arith.constant 0 : i32
    %c0_i32_0 = arith.constant 0 : i32
    %c0_i32_1 = arith.constant 0 : i32
    return %c0_i32, %c0_i32_0 : i32, i32
  }
  func.func @transform_6(%arg0: i32) -> (i32, i32) {
    %c0_i32 = arith.constant 0 : i32
    %c0_i32_0 = arith.constant 0 : i32
    %c0_i32_1 = arith.constant 0 : i32
    return %c0_i32, %c0_i32_0 : i32, i32
  }
  func.func @transform_7(%arg0: i32) -> (i32, i32) {
    %c0_i32 = arith.constant 0 : i32
    %c0_i32_0 = arith.constant 0 : i32
    return %arg0, %c0_i32 : i32, i32
  }
}

</mosaic_0001>

<bundles_post_ra>
// kernel: tpu_custom_call.1
= control target key start
LH: loop header
LB: loop body
LE: loop exit
PB: predicated region body
PF: predicated region fallthrough
CT: control target
= control target key end

     0   :  { %12 = vsyncpa [#allocation3], 0  ;;  %s1381_s0 = inlined_call_operand.hbm [shape: f32[8,512], index: 0, kind: input, shape index: {}]   ;;  %s1382_s1 = inlined_call_operand.vmem [shape: f32[8,2], index: 1, kind: input, shape index: {}]   ;;  %s1383_s2 = inlined_call_operand.hbm [shape: bf16[512,256], index: 2, kind: input, shape index: {}]   ;;  %s1384_s3 = inlined_call_operand.vmem [shape: f32[1,256], index: 3, kind: input, shape index: {}]   ;;  %s1385_s4 = inlined_call_operand.hbm [shape: bf16[256,128], index: 4, kind: input, shape index: {}]   ;;  %s1386_s5 = inlined_call_operand.vmem [shape: f32[1,128], index: 5, kind: input, shape index: {}]   ;;  %s1387_s6 = inlined_call_operand.vmem [shape: f32[2,128], index: 6, kind: input, shape index: {}]   ;;  %s1388_s7 = inlined_call_operand.hbm [shape: f32[8,128], index: 7, kind: output, shape index: {}]  }
   0x1   :  { %13 = vsyncpa [#allocation6], 0  ;;  %s32_s26 = sshll.u32 %s1383_s2, 4  ;;  %s33_s26 = int_to_ptr.hbm [resolvable:$true] %s32_s26 }
   0x2   :  { %14 = vsyncpa [#allocation4], 0  ;;  %s1291_s27 = smov [#allocation5]   ;;  %s20_s8 = sshll.u32 %s1381_s0, 4  ;;  %s21_s8 = int_to_ptr.hbm [resolvable:$true] %s20_s8 }
   0x3   :  { %s34_s28 = sshll.u32 %s1291_s27, 4  ;;  %s1292_s9 = smov 128   ;;  %s35_s28 = int_to_ptr.vmem [resolvable:$true] %s34_s28 }
   0x4   :  { %s1293_s10 = smov 8   ;;  %s1294_s11 = smov [#allocation2]  }
   0x5   :  { %40 = dma.hbm_to_vmem [thread:$0]  %s33_s26, 8192, %s35_s28, [#allocation6], %s1292_s9, %s1292_s9, %s1293_s10  }
   0x6   :  { %s22_s12 = sshll.u32 %s1294_s11, 4  ;;  %s47_s15 = sshll.u32 %s1385_s4, 4  ;;  %s23_s12 = int_to_ptr.vmem [resolvable:$true] %s22_s12  ;;  %s48_s15 = int_to_ptr.hbm [resolvable:$true] %s47_s15 }
   0x7   :  { %25 = dma.hbm_to_vmem [thread:$0]  %s21_s8, 512, %s23_s12, [#allocation3]  }
   0x8   :  { %s1295_s2 = smov [#allocation7]   ;;  %s1296_s17 = smov 64  }
   0x9   :  { %s49_s16 = sshll.u32 %s1295_s2, 4  ;;  %s1297_s18 = smov 4   ;;  %s50_s16 = int_to_ptr.vmem [resolvable:$true] %s49_s16 }
   0xa   :  { %55 = dma.hbm_to_vmem [thread:$0]  %s48_s15, 2048, %s50_s16, [#allocation6], %s1296_s17, %s1296_s17, %s1297_s18  }
   0xb   :  { %1285 = dma.done.wait [#allocation3], 512  }
   0xc   :  { %1286 = vsyncadd [#allocation3], 4294966784 }
   0xd   :  { %1287 = dma.done.wait [#allocation6], 10240  }
   0xe   :  { %1288 = vsyncadd [#allocation6], 4294957056  ;;  %v834_v0 = vld [vmem:[#allocation5 + $0x70] sm:$0xf]  ;;  %v1111_v1 = vld [vmem:[#allocation5 + $0x74] sm:$0xf0] }
   0xf   :  { %v898_v2 = vld [vmem:[#allocation5 + $0xf0] sm:$0xf]  ;;  %v835_v3 = vor.u32 %v1111_v1, %v834_v0  ;;  %v1127_v4 = vld [vmem:[#allocation5 + $0xf4] sm:$0xf0]  ;;  %v826_v11 = vld [vmem:[#allocation5 + $0x60] sm:$0xf] }
  0x10   :  { %v962_v5 = vld [vmem:[#allocation5 + $0x170] sm:$0xf]  ;;  %v1143_v6 = vld [vmem:[#allocation5 + $0x174] sm:$0xf0]  ;;  %v899_v7 = vor.u32 %v1127_v4, %v898_v2  ;;  %v1109_v13 = vld [vmem:[#allocation5 + $0x64] sm:$0xf0] }
  0x11   :  { %v963_v8 = vor.u32 %v1143_v6, %v962_v5  ;;  %v1026_v9 = vld [vmem:[#allocation5 + $0x1f0] sm:$0xf]  ;;  %v1159_v10 = vld [vmem:[#allocation5 + $0x1f4] sm:$0xf0]  ;;  %470 = vmatpush.bf16.msra.mxu0 %v835_v3  ;;  %v890_v14 = vld [vmem:[#allocation5 + $0xe0] sm:$0xf]  ;;  %v827_v16 = vor.u32 %v1109_v13, %v826_v11 }
  0x12   :  { %v1027_v12 = vor.u32 %v1159_v10, %v1026_v9  ;;  %v1125_v15 = vld [vmem:[#allocation5 + $0xe4] sm:$0xf0]  ;;  %483 = vmatpush.bf16.msra.mxu1 %v899_v7  ;;  %v954_v18 = vld [vmem:[#allocation5 + $0x160] sm:$0xf]  ;;  %v818_v23 = vld [vmem:[#allocation5 + $0x50] sm:$0xf] }
  0x13   :  { %496 = vmatpush.bf16.msra.mxu2 %v963_v8  ;;  %v891_v17 = vor.u32 %v1125_v15, %v890_v14  ;;  %v1141_v19 = vld [vmem:[#allocation5 + $0x164] sm:$0xf0]  ;;  %v1018_v20 = vld [vmem:[#allocation5 + $0x1e0] sm:$0xf]  ;;  %v1107_v24 = vld [vmem:[#allocation5 + $0x54] sm:$0xf0] }
  0x14   :  { %509 = vmatpush.bf16.msra.mxu3 %v1027_v12  ;;  %v955_v21 = vor.u32 %v1141_v19, %v954_v18  ;;  %v1157_v22 = vld [vmem:[#allocation5 + $0x1e4] sm:$0xf0]  ;;  %v882_v26 = vld [vmem:[#allocation5 + $0xd0] sm:$0xf]  ;;  %v1123_v27 = vld [vmem:[#allocation5 + $0xd4] sm:$0xf0]  ;;  %v819_v29 = vor.u32 %v1107_v24, %v818_v23 }
  0x15   :  { %v1019_v25 = vor.u32 %v1157_v22, %v1018_v20  ;;  %v946_v28 = vld [vmem:[#allocation5 + $0x150] sm:$0xf]  ;;  %471 = vmatpush.bf16.msra.mxu0 %v827_v16  ;;  %v1139_v30 = vld [vmem:[#allocation5 + $0x154] sm:$0xf0]  ;;  %v883_v33 = vor.u32 %v1123_v27, %v882_v26  ;;  %v810_v35 = vld [vmem:[#allocation5 + $0x40] sm:$0xf] }
  0x16   :  { %v1010_v31 = vld [vmem:[#allocation5 + $0x1d0] sm:$0xf]  ;;  %v1155_v32 = vld [vmem:[#allocation5 + $0x1d4] sm:$0xf0]  ;;  %484 = vmatpush.bf16.msra.mxu1 %v891_v17  ;;  %v947_v34 = vor.u32 %v1139_v30, %v946_v28  ;;  %v1105_v36 = vld [vmem:[#allocation5 + $0x44] sm:$0xf0] }
  0x17   :  { %497 = vmatpush.bf16.msra.mxu2 %v955_v21  ;;  %v874_v37 = vld [vmem:[#allocation5 + $0xc0] sm:$0xf]  ;;  %v1011_v38 = vor.u32 %v1155_v32, %v1010_v31  ;;  %v1121_v39 = vld [vmem:[#allocation5 + $0xc4] sm:$0xf0]  ;;  %v811_v44 = vor.u32 %v1105_v36, %v810_v35  ;;  %v802_v47 = vld [vmem:[#allocation5 + $0x30] sm:$0xf] }
  0x18   :  { %510 = vmatpush.bf16.msra.mxu3 %v1019_v25  ;;  %v938_v40 = vld [vmem:[#allocation5 + $0x140] sm:$0xf]  ;;  %v1137_v41 = vld [vmem:[#allocation5 + $0x144] sm:$0xf0]  ;;  %v875_v45 = vor.u32 %v1121_v39, %v874_v37  ;;  %v1103_v48 = vld [vmem:[#allocation5 + $0x34] sm:$0xf0] }
  0x19   :  { %v1002_v42 = vld [vmem:[#allocation5 + $0x1c0] sm:$0xf]  ;;  %v1153_v43 = vld [vmem:[#allocation5 + $0x1c4] sm:$0xf0]  ;;  %472 = vmatpush.bf16.msra.mxu0 %v819_v29  ;;  %v939_v46 = vor.u32 %v1137_v41, %v938_v40  ;;  %v866_v49 = vld [vmem:[#allocation5 + $0xb0] sm:$0xf]  ;;  %v803_v56 = vor.u32 %v1103_v48, %v802_v47 }
  0x1a   :  { %485 = vmatpush.bf16.msra.mxu1 %v883_v33  ;;  %v1003_v50 = vor.u32 %v1153_v43, %v1002_v42  ;;  %v1119_v51 = vld [vmem:[#allocation5 + $0xb4] sm:$0xf0]  ;;  %v930_v52 = vld [vmem:[#allocation5 + $0x130] sm:$0xf]  ;;  %v794_v59 = vld [vmem:[#allocation5 + $0x20] sm:$0xf] }
  0x1b   :  { %498 = vmatpush.bf16.msra.mxu2 %v947_v34  ;;  %v1135_v53 = vld [vmem:[#allocation5 + $0x134] sm:$0xf0]  ;;  %v994_v54 = vld [vmem:[#allocation5 + $0x1b0] sm:$0xf]  ;;  %v867_v57 = vor.u32 %v1119_v51, %v866_v49  ;;  %v1101_v60 = vld [vmem:[#allocation5 + $0x24] sm:$0xf0] }
  0x1c   :  { %511 = vmatpush.bf16.msra.mxu3 %v1011_v38  ;;  %v1151_v55 = vld [vmem:[#allocation5 + $0x1b4] sm:$0xf0]  ;;  %v931_v58 = vor.u32 %v1135_v53, %v930_v52  ;;  %v858_v61 = vld [vmem:[#allocation5 + $0xa0] sm:$0xf]  ;;  %v1117_v63 = vld [vmem:[#allocation5 + $0xa4] sm:$0xf0]  ;;  %v795_v4 = vor.u32 %v1101_v60, %v794_v59 }
  0x1d   :  { %473 = vmatpush.bf16.msra.mxu0 %v811_v44  ;;  %v995_v62 = vor.u32 %v1151_v55, %v994_v54  ;;  %v922_v0 = vld [vmem:[#allocation5 + $0x120] sm:$0xf]  ;;  %v1133_v1 = vld [vmem:[#allocation5 + $0x124] sm:$0xf0]  ;;  %v859_v5 = vor.u32 %v1117_v63, %v858_v61  ;;  %v786_v7 = vld [vmem:[#allocation5 + $0x10] sm:$0xf] }
  0x1e   :  { %486 = vmatpush.bf16.msra.mxu1 %v875_v45  ;;  %v986_v2 = vld [vmem:[#allocation5 + $0x1a0] sm:$0xf]  ;;  %v1149_v3 = vld [vmem:[#allocation5 + $0x1a4] sm:$0xf0]  ;;  %v923_v6 = vor.u32 %v1133_v1, %v922_v0  ;;  %v1099_v8 = vld [vmem:[#allocation5 + $0x14] sm:$0xf0] }
  0x1f   :  { %499 = vmatpush.bf16.msra.mxu2 %v939_v46  ;;  %v850_v9 = vld [vmem:[#allocation5 + $0x90] sm:$0xf]  ;;  %v987_v10 = vor.u32 %v1149_v3, %v986_v2  ;;  %v1115_v11 = vld [vmem:[#allocation5 + $0x94] sm:$0xf0]  ;;  %v787_v16 = vor.u32 %v1099_v8, %v786_v7  ;;  %v778_v17 = vld [vmem:[#allocation5] sm:$0xf] }
  0x20   :  { %512 = vmatpush.bf16.msra.mxu3 %v1003_v50  ;;  %v914_v12 = vld [vmem:[#allocation5 + $0x110] sm:$0xf]  ;;  %v1131_v13 = vld [vmem:[#allocation5 + $0x114] sm:$0xf0]  ;;  %v1097_v18 = vld [vmem:[#allocation5 + $0x4] sm:$0xf0]  ;;  %v851_v19 = vor.u32 %v1115_v11, %v850_v9 }
  0x21   :  { %474 = vmatpush.bf16.msra.mxu0 %v803_v56  ;;  %v978_v14 = vld [vmem:[#allocation5 + $0x190] sm:$0xf]  ;;  %v1147_v15 = vld [vmem:[#allocation5 + $0x194] sm:$0xf0]  ;;  %v915_v20 = vor.u32 %v1131_v13, %v914_v12  ;;  %v842_v21 = vld [vmem:[#allocation5 + $0x80] sm:$0xf]  ;;  %v779_v31 = vor.u32 %v1097_v18, %v778_v17 }
  0x22   :  { %487 = vmatpush.bf16.msra.mxu1 %v867_v57  ;;  %v1113_v22 = vld [vmem:[#allocation5 + $0x84] sm:$0xf0]  ;;  %v906_v23 = vld [vmem:[#allocation5 + $0x100] sm:$0xf]  ;;  %v979_v24 = vor.u32 %v1147_v15, %v978_v14  ;;  %v1110_v28 = vld [vmem:[#allocation5 + $0x74] sm:$0xf] }
  0x23   :  { %500 = vmatpush.bf16.msra.mxu2 %v931_v58  ;;  %v1129_v25 = vld [vmem:[#allocation5 + $0x104] sm:$0xf0]  ;;  %v970_v26 = vld [vmem:[#allocation5 + $0x180] sm:$0xf]  ;;  %v836_v29 = vld [vmem:[#allocation5 + $0x78] sm:$0xf0]  ;;  %v843_v35 = vor.u32 %v1113_v22, %v842_v21 }
  0x24   :  { %513 = vmatpush.bf16.msra.mxu3 %v995_v62  ;;  %v1145_v27 = vld [vmem:[#allocation5 + $0x184] sm:$0xf0]  ;;  %v1126_v30 = vld [vmem:[#allocation5 + $0xf4] sm:$0xf]  ;;  %v900_v32 = vld [vmem:[#allocation5 + $0xf8] sm:$0xf0]  ;;  %v907_v36 = vor.u32 %v1129_v25, %v906_v23  ;;  %v839_v41 = vor.u32 %v1110_v28, %v836_v29 }
  0x25   :  { %475 = vmatpush.bf16.msra.mxu0 %v795_v4  ;;  %v1142_v33 = vld [vmem:[#allocation5 + $0x174] sm:$0xf]  ;;  %v964_v34 = vld [vmem:[#allocation5 + $0x178] sm:$0xf0]  ;;  %v971_v40 = vor.u32 %v1145_v27, %v970_v26  ;;  %v1108_v42 = vld [vmem:[#allocation5 + $0x64] sm:$0xf]  ;;  %v903_v45 = vor.u32 %v1126_v30, %v900_v32 }
  0x26   :  { %488 = vmatpush.bf16.msra.mxu1 %v859_v5  ;;  %v1158_v37 = vld [vmem:[#allocation5 + $0x1f4] sm:$0xf]  ;;  %v1028_v38 = vld [vmem:[#allocation5 + $0x1f8] sm:$0xf0]  ;;  %v72_v43 = vld [vmem:[#allocation2] sm:$0xff]  ;;  %v967_v46 = vor.u32 %v1142_v33, %v964_v34  ;;  %s1300_s23 = smov [#allocation8]  }
  0x27   :  { %501 = vmatpush.bf16.msra.mxu2 %v923_v6  ;;  %v74_v39 = vld [vmem:[#allocation2 + $0x10] sm:$0xff]  ;;  %v75_v44 = vld [vmem:[#allocation2 + $0x18] sm:$0xff]  ;;  %v828_v47 = vld [vmem:[#allocation5 + $0x68] sm:$0xf0]  ;;  %v1031_v50 = vor.u32 %v1158_v37, %v1028_v38  ;;  %v1352_v57 = vpack.c.bf16 %v72_v43, %v72_v43  ;;  %s763_s24 = sshll.u32 %s1300_s23, 4  ;;  %s765_s27 = sshll.u32 %s1388_s7, 4  ;;  %s764_s24 = int_to_ptr.vmem [resolvable:$true] %s763_s24  ;;  %s766_s27 = int_to_ptr.hbm [resolvable:$true] %s765_s27 }
  0x28   :  { %514 = vmatpush.bf16.msra.mxu3 %v987_v10  ;;  %v1124_v48 = vld [vmem:[#allocation5 + $0xe4] sm:$0xf]  ;;  %v73_v49 = vld [vmem:[#allocation2 + $0x8] sm:$0xff]  ;;  %v1350_v54 = vpack.c.bf16 %v74_v39, %v74_v39  ;;  %v1354_v58 = vpack.c.bf16 %v75_v44, %v75_v44  ;;  %v831_v59 = vor.u32 %v1108_v42, %v828_v47  ;;  %v1106_v63 = vld [vmem:[#allocation5 + $0x54] sm:$0xf] }
  0x29   :  { %476 = vmatpush.bf16.msra.mxu0 %v787_v16  ;;  %v892_v51 = vld [vmem:[#allocation5 + $0xe8] sm:$0xf0]  ;;  %v1140_v52 = vld [vmem:[#allocation5 + $0x164] sm:$0xf]  ;;  %v1356_v60 = vpack.c.bf16 %v73_v49, %v73_v49  ;;  %v820_v0 = vld [vmem:[#allocation5 + $0x58] sm:$0xf0] }
  0x2a   :  { %489 = vmatpush.bf16.msra.mxu1 %v851_v19  ;;  %v956_v53 = vld [vmem:[#allocation5 + $0x168] sm:$0xf0]  ;;  %v1156_v55 = vld [vmem:[#allocation5 + $0x1e4] sm:$0xf]  ;;  %v895_v61 = vor.u32 %v1124_v48, %v892_v51  ;;  %v1122_v1 = vld [vmem:[#allocation5 + $0xd4] sm:$0xf]  ;;  %v823_v8 = vor.u32 %v1106_v63, %v820_v0 }
  0x2b   :  { %502 = vmatpush.bf16.msra.mxu2 %v915_v20  ;;  %v1020_v56 = vld [vmem:[#allocation5 + $0x1e8] sm:$0xf0]  ;;  %v959_v62 = vor.u32 %v1140_v52, %v956_v53  ;;  %v884_v3 = vld [vmem:[#allocation5 + $0xd8] sm:$0xf0]  ;;  %v1138_v4 = vld [vmem:[#allocation5 + $0x154] sm:$0xf] }
  0x2c   :  { %515 = vmatpush.bf16.msra.mxu3 %v979_v24  ;;  %v1023_v2 = vor.u32 %v1156_v55, %v1020_v56  ;;  %v948_v5 = vld [vmem:[#allocation5 + $0x158] sm:$0xf0]  ;;  %v1154_v6 = vld [vmem:[#allocation5 + $0x1d4] sm:$0xf]  ;;  %v887_v9 = vor.u32 %v1122_v1, %v884_v3  ;;  %v1104_v11 = vld [vmem:[#allocation5 + $0x44] sm:$0xf] }
  0x2d   :  { %477 = vmatpush.bf16.msra.mxu0 %v779_v31  ;;  %v1012_v7 = vld [vmem:[#allocation5 + $0x1d8] sm:$0xf0]  ;;  %v951_v10 = vor.u32 %v1138_v4, %v948_v5  ;;  %v812_v12 = vld [vmem:[#allocation5 + $0x48] sm:$0xf0]  ;;  %v1120_v13 = vld [vmem:[#allocation5 + $0xc4] sm:$0xf] }
  0x2e   :  { %490 = vmatpush.bf16.msra.mxu1 %v843_v35  ;;  %v1015_v14 = vor.u32 %v1154_v6, %v1012_v7  ;;  %v876_v15 = vld [vmem:[#allocation5 + $0xc8] sm:$0xf0]  ;;  %v1136_v16 = vld [vmem:[#allocation5 + $0x144] sm:$0xf]  ;;  %v815_v20 = vor.u32 %v1104_v11, %v812_v12  ;;  %v1102_v23 = vld [vmem:[#allocation5 + $0x34] sm:$0xf] }
  0x2f   :  { %503 = vmatpush.bf16.msra.mxu2 %v907_v36  ;;  %v940_v17 = vld [vmem:[#allocation5 + $0x148] sm:$0xf0]  ;;  %v1152_v18 = vld [vmem:[#allocation5 + $0x1c4] sm:$0xf]  ;;  %v879_v21 = vor.u32 %v1120_v13, %v876_v15  ;;  %v804_v24 = vld [vmem:[#allocation5 + $0x38] sm:$0xf0] }
  0x30   :  { %516 = vmatpush.bf16.msra.mxu3 %v971_v40  ;;  %478 = vmatmul.bf16.vlgmr.msra.gmra.mxu0 %v1352_v57  ;;  %v1004_v19 = vld [vmem:[#allocation5 + $0x1c8] sm:$0xf0]  ;;  %v943_v22 = vor.u32 %v1136_v16, %v940_v17  ;;  %v1118_v25 = vld [vmem:[#allocation5 + $0xb4] sm:$0xf]  ;;  %v868_v27 = vld [vmem:[#allocation5 + $0xb8] sm:$0xf0]  ;;  %v807_v32 = vor.u32 %v1102_v23, %v804_v24 }
  0x31   :  { %522 = vmatpush.bf16.msrb.mxu0 %v839_v41  ;;  %491 = vmatmul.bf16.vlgmr.msra.gmra.mxu1 %v1356_v60  ;;  %v1007_v26 = vor.u32 %v1152_v18, %v1004_v19  ;;  %v1134_v28 = vld [vmem:[#allocation5 + $0x134] sm:$0xf]  ;;  %v932_v29 = vld [vmem:[#allocation5 + $0x138] sm:$0xf0]  ;;  %v871_v33 = vor.u32 %v1118_v25, %v868_v27  ;;  %v1100_v35 = vld [vmem:[#allocation5 + $0x24] sm:$0xf] }
  0x32   :  { %535 = vmatpush.bf16.msrb.mxu1 %v903_v45  ;;  %504 = vmatmul.bf16.vlgmr.msra.gmra.mxu2 %v1350_v54  ;;  %v1150_v30 = vld [vmem:[#allocation5 + $0x1b4] sm:$0xf]  ;;  %v996_v31 = vld [vmem:[#allocation5 + $0x1b8] sm:$0xf0]  ;;  %v935_v34 = vor.u32 %v1134_v28, %v932_v29  ;;  %v796_v36 = vld [vmem:[#allocation5 + $0x28] sm:$0xf0] }
  0x33   :  { %548 = vmatpush.bf16.msrb.mxu2 %v967_v46  ;;  %517 = vmatmul.bf16.vlgmr.msra.gmra.mxu3 %v1354_v58  ;;  %v1116_v37 = vld [vmem:[#allocation5 + $0xa4] sm:$0xf]  ;;  %v999_v38 = vor.u32 %v1150_v30, %v996_v31  ;;  %v860_v39 = vld [vmem:[#allocation5 + $0xa8] sm:$0xf0]  ;;  %v799_v44 = vor.u32 %v1100_v35, %v796_v36  ;;  %v1098_v47 = vld [vmem:[#allocation5 + $0x14] sm:$0xf] }
  0x34   :  { %561 = vmatpush.bf16.msrb.mxu3 %v1031_v50  ;;  %v1132_v40 = vld [vmem:[#allocation5 + $0x124] sm:$0xf]  ;;  %v924_v41 = vld [vmem:[#allocation5 + $0x128] sm:$0xf0]  ;;  %v863_v45 = vor.u32 %v1116_v37, %v860_v39  ;;  %v788_v48 = vld [vmem:[#allocation5 + $0x18] sm:$0xf0] }
  0x35   :  { %523 = vmatpush.bf16.msrb.mxu0 %v831_v59  ;;  %v1148_v42 = vld [vmem:[#allocation5 + $0x1a4] sm:$0xf]  ;;  %v988_v43 = vld [vmem:[#allocation5 + $0x1a8] sm:$0xf0]  ;;  %v927_v46 = vor.u32 %v1132_v40, %v924_v41  ;;  %v1114_v49 = vld [vmem:[#allocation5 + $0x94] sm:$0xf]  ;;  %v791_v59 = vor.u32 %v1098_v47, %v788_v48 }
  0x36   :  { %536 = vmatpush.bf16.msrb.mxu1 %v895_v61  ;;  %v991_v50 = vor.u32 %v1148_v42, %v988_v43  ;;  %v852_v51 = vld [vmem:[#allocation5 + $0x98] sm:$0xf0]  ;;  %v1130_v52 = vld [vmem:[#allocation5 + $0x114] sm:$0xf]  ;;  %v1096_v63 = vld [vmem:[#allocation5 + $0x4] sm:$0xf] }
  0x37   :  { %549 = vmatpush.bf16.msrb.mxu2 %v959_v62  ;;  %v916_v53 = vld [vmem:[#allocation5 + $0x118] sm:$0xf0]  ;;  %v1146_v55 = vld [vmem:[#allocation5 + $0x194] sm:$0xf]  ;;  %v855_v61 = vor.u32 %v1114_v49, %v852_v51  ;;  %v780_v0 = vld [vmem:[#allocation5 + $0x8] sm:$0xf0] }
  0x38   :  { %562 = vmatpush.bf16.msrb.mxu3 %v1023_v2  ;;  %v980_v56 = vld [vmem:[#allocation5 + $0x198] sm:$0xf0]  ;;  %v919_v62 = vor.u32 %v1130_v52, %v916_v53  ;;  %v1112_v1 = vld [vmem:[#allocation5 + $0x84] sm:$0xf]  ;;  %v844_v3 = vld [vmem:[#allocation5 + $0x88] sm:$0xf0] }
  0x39   :  { %524 = vmatpush.bf16.msrb.mxu0 %v823_v8  ;;  %v983_v2 = vor.u32 %v1146_v55, %v980_v56  ;;  %v1128_v4 = vld [vmem:[#allocation5 + $0x104] sm:$0xf]  ;;  %v908_v5 = vld [vmem:[#allocation5 + $0x108] sm:$0xf0]  ;;  %v783_v8 = vor.u32 %v1096_v63, %v780_v0  ;;  %v1167_v12 = vld [vmem:[#allocation7 + $0x38] sm:$0xff]  ;;  %v1298_v25 = vmov 0  }
  0x3a   :  { %537 = vmatpush.bf16.msrb.mxu1 %v887_v9  ;;  %v1144_v6 = vld [vmem:[#allocation5 + $0x184] sm:$0xf]  ;;  %v972_v7 = vld [vmem:[#allocation5 + $0x188] sm:$0xf0]  ;;  %v847_v9 = vor.u32 %v1112_v1, %v844_v3  ;;  %v1166_v13 = vld [vmem:[#allocation7 + $0x30] sm:$0xff]  ;;  %1186 = vset.pattern.permute.xlu0 %v1298_v25  ;;  %v1299_v43 = vmov 1  }
  0x3b   :  { %550 = vmatpush.bf16.msrb.mxu2 %v951_v10  ;;  %v911_v10 = vor.u32 %v1128_v4, %v908_v5  ;;  %v975_v11 = vor.u32 %v1144_v6, %v972_v7  ;;  %v1164_v15 = vld [vmem:[#allocation7 + $0x20] sm:$0xff]  ;;  %v1163_v16 = vld [vmem:[#allocation7 + $0x18] sm:$0xff]  ;;  %v1162_v17 = vld [vmem:[#allocation7 + $0x10] sm:$0xff] }
  0x3c   :  { %563 = vmatpush.bf16.msrb.mxu3 %v1015_v14  ;;  %v1165_v14 = vld [vmem:[#allocation7 + $0x28] sm:$0xff]  ;;  %v1175_v19 = vld [vmem:[#allocation7 + $0x78] sm:$0xff]  ;;  %v1170_v23 = vld [vmem:[#allocation7 + $0x50] sm:$0xff] }
  0x3d   :  { %525 = vmatpush.bf16.msrb.mxu0 %v815_v20  ;;  %v1161_v18 = vld [vmem:[#allocation7 + $0x8] sm:$0xff]  ;;  %v1160_v20 = vld [vmem:[#allocation7] sm:$0xff] }
  0x3e   :  { %538 = vmatpush.bf16.msrb.mxu1 %v879_v21  ;;  %v614_v29 = vld [vmem:[%s1382_s1] sm:$0xff]  ;;  %v1169_v31 = vld [vmem:[#allocation7 + $0x48] sm:$0xff] }
  0x3f   :  { %551 = vmatpush.bf16.msrb.mxu2 %v943_v22  ;;  %v1171_v22 = vld [vmem:[#allocation7 + $0x58] sm:$0xff]  ;;  %618 = vperm.xlu0 %1186, %v614_v29   ;;  %v1168_v37 = vld [vmem:[#allocation7 + $0x40] sm:$0xff] }
  0x40   :  { %564 = vmatpush.bf16.msrb.mxu3 %v1007_v26 }
  0x41   :  { %526 = vmatpush.bf16.msrb.mxu0 %v807_v32 }
  0x42   :  { %539 = vmatpush.bf16.msrb.mxu1 %v871_v33 }
  0x43   :  { %552 = vmatpush.bf16.msrb.mxu2 %v935_v34 }
  0x44   :  { %565 = vmatpush.bf16.msrb.mxu3 %v999_v38 }
  0x45   :  { %527 = vmatpush.bf16.msrb.mxu0 %v799_v44 }
  0x46   :  { %540 = vmatpush.bf16.msrb.mxu1 %v863_v45 }
  0x47   :  { %553 = vmatpush.bf16.msrb.mxu2 %v927_v46  ;;  %1187 = vset.pattern.permute.xlu0 %v1299_v43 }
  0x48   :  { %566 = vmatpush.bf16.msrb.mxu3 %v991_v50  ;;  %746 = vperm.xlu0 %1187, %v614_v29  }
  0x49   :  { %528 = vmatpush.bf16.msrb.mxu0 %v791_v59 }
  0x4a   :  { %541 = vmatpush.bf16.msrb.mxu1 %v855_v61 }
  0x4b   :  { %554 = vmatpush.bf16.msrb.mxu2 %v919_v62 }
  0x4c   :  { %567 = vmatpush.bf16.msrb.mxu3 %v983_v2  ;;  %v615_v2 = vld [vmem:[%s1387_s6] sm:$0x3] }
  0x4d   :  { %529 = vmatpush.bf16.msrb.mxu0 %v783_v8  ;;  %v621_v4 = vperm.slane %v615_v2, 0  ;;  %v749_v6 = vperm.slane %v615_v2, 1 }
  0x4e   :  { %542 = vmatpush.bf16.msrb.mxu1 %v847_v9 }
  0x4f   :  { %555 = vmatpush.bf16.msrb.mxu2 %v911_v10 }
  0x50   :  { %568 = vmatpush.bf16.msrb.mxu3 %v975_v11  ;;  %530 = vmatmul.bf16.vlgmr.msrb.gmra.mxu0 %v1352_v57  ;;  %v1174_v57 = vld [vmem:[#allocation7 + $0x70] sm:$0xff] }
  0x51   :  { %719 = vmatpush.bf16.msra.mxu0 %v1167_v12  ;;  %543 = vmatmul.bf16.vlgmr.msrb.gmra.mxu1 %v1356_v60  ;;  %v144_v60 = vld [vmem:[%s1384_s3] sm:$0x3] }
  0x52   :  { %556 = vmatmul.bf16.vlgmr.msrb.gmra.mxu2 %v1350_v54  ;;  %732 = vmatpush.bf16.msra.mxu1 %v1175_v19  ;;  %v1173_v54 = vld [vmem:[#allocation7 + $0x68] sm:$0xff]  ;;  %v146_v21 = vperm.slane %v144_v60, 0  ;;  %v147_v44 = vperm.slane %v144_v60, 1  ;;  %v1188_v12 = vld [vmem:[%s1386_s5] ss:$0 sm:$0xff] }
  0x53   :  { %569 = vmatmul.bf16.vlgmr.msrb.gmra.mxu3 %v1354_v58  ;;  %v1172_v58 = vld [vmem:[#allocation7 + $0x60] sm:$0xff] }
  0x55   :  { %720 = vmatpush.bf16.msra.mxu0 %v1166_v13 }
  0x56   :  { %733 = vmatpush.bf16.msra.mxu1 %v1174_v57 }
  0x59   :  { %721 = vmatpush.bf16.msra.mxu0 %v1165_v14 }
  0x5a   :  { %734 = vmatpush.bf16.msra.mxu1 %v1173_v54 }
  0x5d   :  { %722 = vmatpush.bf16.msra.mxu0 %v1164_v15 }
  0x5e   :  { %735 = vmatpush.bf16.msra.mxu1 %v1172_v58 }
  0x61   :  { %723 = vmatpush.bf16.msra.mxu0 %v1163_v16 }
  0x62   :  { %736 = vmatpush.bf16.msra.mxu1 %v1171_v22 }
  0x65   :  { %724 = vmatpush.bf16.msra.mxu0 %v1162_v17 }
  0x66   :  { %737 = vmatpush.bf16.msra.mxu1 %v1170_v23 }
  0x69   :  { %725 = vmatpush.bf16.msra.mxu0 %v1161_v18 }
  0x6a   :  { %738 = vmatpush.bf16.msra.mxu1 %v1169_v31 }
  0x6d   :  { %726 = vmatpush.bf16.msra.mxu0 %v1160_v20 }
  0x6e   :  { %739 = vmatpush.bf16.msra.mxu1 %v1168_v37 }
  0xad   :  { %v479_v24 = vpop.f32.mrf.mxu0 }
  0xae   :  { %v480_v26 = vadd.f32 %v479_v24, %v146_v21  ;;  %v492_v27 = vpop.f32.mrf.mxu1 }
  0xb0   :  { %v493_v28 = vadd.f32 %v492_v27, %v480_v26 }
  0xb1   :  { %v619_v3 = vpop.permute.xlu0 %618 }
  0xb2   :  { %v622_v5 = vmul.f32 %v621_v4, %v619_v3 }
  0xb5   :  { %v505_v30 = vpop.f32.mrf.mxu2  ;;  %v481_v35 = vpop.f32.mrf.mxu0 }
  0xb6   :  { %v506_v32 = vadd.f32 %v505_v30, %v493_v28  ;;  %v518_v33 = vpop.f32.mrf.mxu3  ;;  %v494_v36 = vpop.f32.mrf.mxu1 }
  0xb8   :  { %v519_v34 = vadd.f32 %v518_v33, %v506_v32 }
  0xba   :  { %vm574_vm0 = vcmp.ge.f32.partialorder %v519_v34, 0.0  ;;  %v576_v38 = vmul.f32 0.01, %v519_v34  ;;  %v747_v7 = vpop.permute.xlu0 %746 }
  0xbb   :  { %v750_v8 = vmul.f32 %v749_v6, %v747_v7 }
  0xbc   :  { %v578_v39 = vsel %vm574_vm0, %v519_v34, %v576_v38 }
  0xbd   :  { %v580_v40 = vpack.c.bf16 %v578_v39, %v578_v39  ;;  %v507_v41 = vpop.f32.mrf.mxu2 }
  0xbe   :  { %v520_v42 = vpop.f32.mrf.mxu3 }
  0xbf   :  { %727 = vmatmul.bf16.vlgmr.msra.gmra.mxu0 %v580_v40 }
  0xcd   :  { %v531_v45 = vpop.f32.mrf.mxu0 }
  0xce   :  { %v532_v46 = vadd.f32 %v531_v45, %v147_v44  ;;  %v544_v47 = vpop.f32.mrf.mxu1 }
  0xd0   :  { %v545_v48 = vadd.f32 %v544_v47, %v532_v46 }
  0xd5   :  { %v557_v49 = vpop.f32.mrf.mxu2  ;;  %v533_v52 = vpop.f32.mrf.mxu0 }
  0xd6   :  { %v558_v50 = vadd.f32 %v557_v49, %v545_v48  ;;  %v570_v51 = vpop.f32.mrf.mxu3  ;;  %v546_v53 = vpop.f32.mrf.mxu1 }
  0xd8   :  { %v571_v55 = vadd.f32 %v570_v51, %v558_v50 }
  0xda   :  { %vm575_vm1 = vcmp.ge.f32.partialorder %v571_v55, 0.0  ;;  %v577_v56 = vmul.f32 0.01, %v571_v55 }
  0xdc   :  { %v579_v59 = vsel %vm575_vm1, %v571_v55, %v577_v56 }
  0xdd   :  { %v581_v61 = vpack.c.bf16 %v579_v59, %v579_v59  ;;  %v559_v62 = vpop.f32.mrf.mxu2 }
  0xde   :  { %v572_v63 = vpop.f32.mrf.mxu3 }
  0xdf   :  { %740 = vmatmul.bf16.vlgmr.msra.gmra.mxu1 %v581_v61 }
 0x13c   :  { %v728_v0 = vpop.f32.mrf.mxu0 }
 0x13d   :  { %v729_v9 = vadd.f32 %v728_v0, %v622_v5 }
 0x144   :  { %v730_v1 = vpop.f32.mrf.mxu0 }
 0x15c   :  { %v741_v10 = vpop.f32.mrf.mxu1 }
 0x15d   :  { %v742_v11 = vadd.f32 %v741_v10, %v729_v9 }
 0x15f   :  { %v751_v13 = vadd.f32 %v750_v8, %v742_v11 }
 0x161   :  { %v756_v14 = vadd.f32 %v1188_v12, %v751_v13 }
 0x163   :  { %757 = vst [vmem:[#allocation8] sm:$0xff] %v756_v14 }
 0x164   :  { %v743_v15 = vpop.f32.mrf.mxu1  ;;  %768 = dma.vmem_to_hbm [thread:$0]  %s764_s24, 128, %s766_s27, [#allocation4]  }
 0x165   :  { %1289 = dma.done.wait [#allocation4], 128  }
 0x166   :  { %1290 = vsyncadd [#allocation4], 4294967168 }
 0x167   :  { %773 = vsyncpa [#allocation3], 1 }
 0x168   :  { %774 = vsyncpa [#allocation6], 1 }
 0x169   :  { %775 = vsyncpa [#allocation4], 1 }

</bundles_post_ra>
